<compile_context>
chip_gen: v7x
topology: tpu7x:2x2x1
jax: 0.10.0
libtpu: 0.0.40
codegen_flags: <defaults>
</compile_context>

<pallas_src>
import functools
import math
from typing import NamedTuple, Optional

import jax
import jax.numpy as jnp
from jax.experimental import pallas as pl
from jax.experimental.pallas import tpu as pltpu


def _round_up(x: int, m: int) -> int:
    return ((x + m - 1) // m) * m


def _vmem_budget_bytes() -> int:
    """Generation-aware scoped-VMEM budget (3/4 of physical, v7x-safe fallback)."""
    try:
        cap = int(getattr(pltpu.get_tpu_info(), "vmem_capacity_bytes", 64 << 20))
    except Exception:
        cap = 64 << 20
    return max(32 << 20, (cap * 3) // 4)


# ----------------------------------------------------------------------------
# Prepared GSOs: pad + cast + triangular block-skip table, hoisted out of the
# per-forward path (review item).
# ----------------------------------------------------------------------------
class PreparedGSOs(NamedTuple):
    gsos: jax.Array     # (K, N_pad, N_pad) stream dtype, zero padded
    jstart: jax.Array   # (N_pad//TM,) int32: first nonzero column block per row tile
    n: int
    n_pad: int
    tm: int
    tk: int


def prepare_gsos(GSOs, *, tm_target: int = 512, tk_target: int = 2048,
                 stream_dtype=jnp.bfloat16, max_feat_dim: int = 128) -> PreparedGSOs:
    K, N, N2 = GSOs.shape
    assert N == N2, "GSOs must be (K, N, N)"
    tm_target = _round_up(max(tm_target, 128), 128)

    # Row tile: multiple of 16 (bf16 sublanes); always >= 2 row tiles so the
    # 'parallel' row axis feeds both v7x TensorCores even for small graphs.
    n128 = _round_up(N, 128)
    tm = tm_target if n128 >= 2 * tm_target else max(16, n128 // 2)
    n_pad = _round_up(n128, tm)

    # Contraction tile: largest multiple of 128 dividing n_pad, <= tk_target,
    # that fits the VMEM budget together with the resident XW block.
    budget = _vmem_budget_bytes()
    dout_pad = _round_up(max_feat_dim, 128)
    fixed = (2 * n_pad * dout_pad * 2      # resident XW (worst case 2 buffers)
             + 3 * tm * dout_pad * 4       # output block + f32 accumulator
             + (4 << 20))                  # bias + headroom
    tk, cand = 128, 128
    while cand <= min(tk_target, n_pad):
        if n_pad % cand == 0 and fixed + 2 * tm * cand * 2 <= budget:
            tk = cand
        cand += 128

    pad = n_pad - N
    gsos = jnp.pad(GSOs.astype(stream_dtype), ((0, 0), (0, pad), (0, pad)))

    # Per-row-tile first nonzero column block (suffix skip).  Strictly-upper-
    # triangular DAG GSOs -> ~half the blocks are skipped; dense GSOs -> all 0.
    n_row, n_col = n_pad // tm, n_pad // tk
    nz = (gsos != 0).any(axis=0)                                   # (n_pad, n_pad)
    blk_nz = nz.reshape(n_row, tm, n_col, tk).any(axis=(1, 3))     # (n_row, n_col)
    jstart = jnp.where(blk_nz.any(axis=1),
                       jnp.argmax(blk_nz, axis=1),
                       n_col).astype(jnp.int32)

    return PreparedGSOs(gsos=gsos, jstart=jstart, n=N, n_pad=n_pad, tm=tm, tk=tk)


# ----------------------------------------------------------------------------
# Kernel 1: XW = X @ W, row-tiled (tiny vs the GSO stream; off its critical path)
# ----------------------------------------------------------------------------
def _xw_kernel(x_ref, w_ref, o_ref):
    x = x_ref[...].astype(jnp.float32)
    w = w_ref[...].astype(jnp.float32)
    o_ref[...] = jnp.dot(x, w, preferred_element_type=jnp.float32).astype(o_ref.dtype)


def _xw_matmul(Xp, Wp, *, tm, out_dtype):
    n_pad, din_pad = Xp.shape
    dout_pad = Wp.shape[1]
    return pl.pallas_call(
        _xw_kernel,
        out_shape=jax.ShapeDtypeStruct((n_pad, dout_pad), out_dtype),
        grid=(n_pad // tm,),
        in_specs=[pl.BlockSpec((tm, din_pad), lambda i: (i, 0)),
                  pl.BlockSpec((din_pad, dout_pad), lambda i: (0, 0))],
        out_specs=pl.BlockSpec((tm, dout_pad), lambda i: (i, 0)),
        compiler_params=pltpu.CompilerParams(dimension_semantics=("parallel",)),
    )(Xp, Wp)


# ----------------------------------------------------------------------------
# Kernel 2: out = sum_k h[k] * (GSOs[k] @ XW) (+ bias) (+ ReLU)
# Grid (N_pad//TM, K, N_pad//TK): row tiles "parallel", (K, col-block) reduction
# "arbitrary".  f32 accumulation in a VMEM scratch; output written only in the
# epilogue (bf16 for intermediate layers, f32 for the last one).
# ----------------------------------------------------------------------------
def _dag_layer_kernel(h_ref, jstart_ref, xw_ref, gso_ref, *rest,
                      tk, apply_relu, use_bias):
    if use_bias:
        b_ref, o_ref, acc_ref = rest
    else:
        o_ref, acc_ref = rest

    i, k, j = pl.program_id(0), pl.program_id(1), pl.program_id(2)
    n_col = pl.num_programs(2)
    last_k = pl.num_programs(1) - 1

    @pl.when(jnp.logical_and(k == 0, j == 0))
    def _():
        acc_ref[...] = jnp.zeros_like(acc_ref)

    # Effective contraction block for this step; steps past the valid suffix
    # are duplicates of the last valid block (no DMA) and are skipped here.
    j_eff = j + jstart_ref[i]

    @pl.when(j_eff < n_col)
    def _():
        row0 = pl.multiple_of(j_eff * tk, tk)
        xw_blk = xw_ref[pl.ds(row0, tk), :]          # (tk, dout_pad) slice of resident XW
        acc_ref[...] += h_ref[k] * jnp.dot(gso_ref[...], xw_blk,
                                           preferred_element_type=jnp.float32)

    @pl.when(jnp.logical_and(k == last_k, j == n_col - 1))
    def _():
        out = acc_ref[...]
        if use_bias:
            out = out + b_ref[...]                   # (1, dout_pad) broadcasts over rows
        if apply_relu:
            out = jnp.maximum(out, 0.0)
        o_ref[...] = out.astype(o_ref.dtype)


def _dag_gso_layer(h, jstart, XW, GSOs_p, b_pad, *, tm, tk, apply_relu, out_dtype):
    n_pad, dout_pad = XW.shape
    K = GSOs_p.shape[0]
    n_row, n_col = n_pad // tm, n_pad // tk
    use_bias = b_pad is not None

    def gso_map(i, k, j, h_ref, js_ref):
        # Enumerate the valid column-block suffix [jstart[i], n_col) first;
        # leftover steps repeat the last valid block so their DMA is elided.
        return (k, i, jnp.minimum(j + js_ref[i], n_col - 1))

    const_map = lambda i, k, j, h_ref, js_ref: (0, 0)
    out_map = lambda i, k, j, h_ref, js_ref: (i, 0)

    # VMEM accounting (conservative: 2 buffers for the resident blocks).
    s_item = jnp.dtype(GSOs_p.dtype).itemsize
    o_item = jnp.dtype(out_dtype).itemsize
    vmem_need = (2 * tm * tk * s_item              # GSO tile, double buffered
                 + 2 * n_pad * dout_pad * s_item   # resident XW
                 + 2 * tm * dout_pad * o_item      # output block
                 + tm * dout_pad * 4               # f32 accumulator scratch
                 + 2 * 8 * dout_pad * 4)           # bias block
    budget = _vmem_budget_bytes()
    if vmem_need + (4 << 20) > budget:
        raise ValueError(
            f"DAGConv GSO kernel needs ~{vmem_need>>20} MiB VMEM but the budget is "
            f"{budget>>20} MiB; reduce tm_target/tk_target in prepare_gsos().")
    vmem_limit = int(min(max(vmem_need + (4 << 20), 32 << 20), budget))

    kernel = functools.partial(_dag_layer_kernel, tk=tk,
                               apply_relu=apply_relu, use_bias=use_bias)

    def build(resident_kwargs):
        in_specs = [pl.BlockSpec((n_pad, dout_pad), const_map, **resident_kwargs),
                    pl.BlockSpec((pl.Squeezed(), tm, tk), gso_map)]
        args = [XW, GSOs_p]
        if use_bias:
            in_specs.append(pl.BlockSpec((1, dout_pad), const_map, **resident_kwargs))
            args.append(b_pad)
        return pl.pallas_call(
            kernel,
            out_shape=jax.ShapeDtypeStruct((n_pad, dout_pad), out_dtype),
            grid_spec=pltpu.PrefetchScalarGridSpec(
                num_scalar_prefetch=2,                # h (f32) and jstart (i32) -> SMEM
                grid=(n_row, K, n_col),
                in_specs=in_specs,
                out_specs=pl.BlockSpec((tm, dout_pad), out_map),
                scratch_shapes=[pltpu.VMEM((tm, dout_pad), jnp.float32)]),
            compiler_params=pltpu.CompilerParams(
                dimension_semantics=("parallel", "arbitrary", "arbitrary"),
                vmem_limit_bytes=vmem_limit),
        )(h, jstart, *args)

    try:
        # Constant-index XW / bias blocks only need a single VMEM buffer.
        return build(dict(pipeline_mode=pl.Buffered(1)))
    except Exception:
        # Fallback: default double-buffering if Buffered(1) is unsupported here.
        return build({})


# ----------------------------------------------------------------------------
# Forward pass (DAGConv): ReLU after every layer except the last (last_act=None)
# ----------------------------------------------------------------------------
def dag_conv_forward(X, gsos, params, *, stream_dtype=jnp.bfloat16,
                     tm_target=512, tk_target=2048):
    """X: (N, in_dim) f32; gsos: (K, N, N) array or PreparedGSOs; params: [(h, W, b)]."""
    if not isinstance(gsos, PreparedGSOs):
        gsos = prepare_gsos(gsos, tm_target=tm_target, tk_target=tk_target,
                            stream_dtype=stream_dtype)
    N, n_pad, tm, tk = gsos.n, gsos.n_pad, gsos.tm, gsos.tk
    assert X.shape[0] == N

    in_dim = X.shape[1]
    out_dim = params[-1][1].shape[1]
    n_layers = len(params)

    # Padding correctness: padded node rows pick up bias (+ReLU) garbage in the
    # intermediate activations, but the padded GSO *columns* are exactly zero,
    # so that garbage can never leak into real rows; everything padded is
    # sliced off at the end.  Do not relax the zero-padding in prepare_gsos.
    din_pad0 = _round_up(in_dim, 128)
    Xp = jnp.pad(X.astype(jnp.float32), ((0, n_pad - N), (0, din_pad0 - in_dim)))

    for li, (h, W, b) in enumerate(params):
        din, dout = W.shape
        din_pad, dout_pad = _round_up(din, 128), _round_up(dout, 128)
        assert Xp.shape[1] == din_pad
        Wp = jnp.pad(W.astype(jnp.float32),
                     ((0, din_pad - din), (0, dout_pad - dout)))
        bp = (jnp.pad(b.astype(jnp.float32),
                      (0, dout_pad - dout)).reshape(1, dout_pad)
              if b is not None else None)
        last = li == n_layers - 1

        XW = _xw_matmul(Xp, Wp, tm=tm, out_dtype=stream_dtype)
        Xp = _dag_gso_layer(h.astype(jnp.float32), gsos.jstart, XW, gsos.gsos, bp,
                            tm=tm, tk=tk, apply_relu=not last,
                            out_dtype=jnp.float32 if last else stream_dtype)

    return Xp[:N, :out_dim]


# ----------------------------------------------------------------------------
# Parameter init (deterministic, mirrors the PyTorch __init__)
# ----------------------------------------------------------------------------
def init_dag_conv_params(key, in_dim, hid_dim, out_dim, K, n_layers, bias=True):
    dims = ([in_dim, out_dim] if n_layers == 1
            else [in_dim] + [hid_dim] * (n_layers - 1) + [out_dim])
    params = []
    for li in range(n_layers):
        din, dout = dims[li], dims[li + 1]
        key, wkey = jax.random.split(key)
        h = jnp.full((K,), math.sqrt(1.0 / K), dtype=jnp.float32)
        bound = math.sqrt(6.0 / (din + dout))                 # xavier_uniform_
        W = jax.random.uniform(wkey, (din, dout), jnp.float32, -bound, bound)
        b = jnp.zeros((dout,), jnp.float32) if bias else None
        params.append((h, W, b))
    return params


# ----------------------------------------------------------------------------
# Pure-JAX reference mirroring the kernel numerics (GSOs / XW / intermediate
# activations rounded to the stream dtype, accumulation in f32).
# ----------------------------------------------------------------------------
def dag_conv_reference(X, GSOs, params, *, stream_dtype=jnp.bfloat16):
    hp = jax.lax.Precision.HIGHEST
    G = GSOs.astype(stream_dtype).astype(jnp.float32)
    Xa = X.astype(jnp.float32)
    n_layers = len(params)
    for li, (h, W, b) in enumerate(params):
        XW = jnp.dot(Xa, W.astype(jnp.float32), precision=hp)
        XW = XW.astype(stream_dtype).astype(jnp.float32)
        prod = jnp.matmul(G, XW, precision=hp)                 # (K, N, dout)
        out = jnp.sum(h[:, None, None] * prod, axis=0)
        if b is not None:
            out = out + b[None, :]
        if li < n_layers - 1:
            out = jnp.maximum(out, 0.0)
            Xa = out.astype(stream_dtype).astype(jnp.float32)  # bf16 activations
        else:
            return out


if __name__ == "__main__":
    # Small shapes: N nodes with in/hid/out feature dims, K GSOs, 3 layers.
    N, in_dim, hid_dim, out_dim, K, n_layers = 16, 8, 32, 4, 3, 3

    key = jax.random.PRNGKey(0)
    key, xk, gk = jax.random.split(key, 3)
    X = jax.random.normal(xk, (N, in_dim), jnp.float32)
    # Synthetic strictly-upper-triangular GSOs (DAG-like shift operators).
    GSOs = jax.random.normal(gk, (K, N, N), jnp.float32)
    GSOs = GSOs * jnp.triu(jnp.ones((N, N), jnp.float32), k=1)[None]

    params = init_dag_conv_params(key, in_dim, hid_dim, out_dim, K, n_layers,
                                  bias=True)

    # GSO pad + cast + block-skip table hoisted to setup (done once per graph).
    prep = prepare_gsos(GSOs)
    out = dag_conv_forward(X, prep, params)
    out = jax.block_until_ready(out)

    ref = dag_conv_reference(X, GSOs, params)
    assert out.shape == (N, out_dim)
    max_err = float(jnp.max(jnp.abs(out - ref)))
    assert jnp.allclose(out, ref, atol=2e-2, rtol=2e-2), \
        f"mismatch vs reference (max abs err {max_err})"

    print("KERNEL_OK")
</pallas_src>

<mosaic_0001>
module attributes {stable_mosaic.version = 11 : i64} {
  func.func @_xw_kernel(%arg0: i32, %arg1: memref<64x128xf32, #tpu.memory_space<vmem>>, %arg2: memref<128x128xf32, #tpu.memory_space<vmem>>, %arg3: memref<64x128xbf16, #tpu.memory_space<vmem>>) attributes {dimension_semantics = [#tpu.dimension_semantics<parallel>], iteration_bounds = array<i64: 2>, scalar_prefetch = 0 : i64, scratch_operands = 0 : i64, tpu.core_type = #tpu.core_type<tc>, window_params = [{transform_indices = @transform_0, window_bounds = array<i64: 64, 128>}, {pipeline_mode = #tpu.pipeline_mode<synchronous>, transform_indices = @transform_1, window_bounds = array<i64: 128, 128>}, {transform_indices = @transform_2, window_bounds = array<i64: 64, 128>}]} {
    %c0 = arith.constant 0 : index
    %c0_0 = arith.constant 0 : index
    %0 = vector.load %arg1[%c0, %c0_0] : memref<64x128xf32, #tpu.memory_space<vmem>>, vector<64x128xf32>
    %c0_1 = arith.constant 0 : index
    %c0_2 = arith.constant 0 : index
    %1 = vector.load %arg2[%c0_1, %c0_2] : memref<128x128xf32, #tpu.memory_space<vmem>>, vector<128x128xf32>
    %cst = arith.constant dense<0.000000e+00> : vector<64x128xf32>
    %2 = tpu.matmul %0, %1, %cst {dimension_numbers = #tpu.dot_dimension_numbers<[1], [0], [0], [1], [0, 0, 1, 1], [], []>} : vector<64x128xf32>, vector<128x128xf32>, vector<64x128xf32> -> vector<64x128xf32>
    %3 = arith.truncf %2 : vector<64x128xf32> to vector<64x128xbf16>
    %c0_3 = arith.constant 0 : index
    %c0_4 = arith.constant 0 : index
    %4 = vector.load %arg3[%c0_3, %c0_4] : memref<64x128xbf16, #tpu.memory_space<vmem>>, vector<64x128xbf16>
    tpu.vector_store %arg3[%c0_3, %c0_4], %3 {strides = array<i32>} : memref<64x128xbf16, #tpu.memory_space<vmem>>, vector<64x128xbf16>,
    return
  }
  func.func @transform_0(%arg0: i32) -> (i32, i32) {
    %c0_i32 = arith.constant 0 : i32
    %c0_i32_0 = arith.constant 0 : i32
    return %arg0, %c0_i32 : i32, i32
  }
  func.func @transform_1(%arg0: i32) -> (i32, i32) {
    %c0_i32 = arith.constant 0 : i32
    %c0_i32_0 = arith.constant 0 : i32
    %c0_i32_1 = arith.constant 0 : i32
    return %c0_i32, %c0_i32_0 : i32, i32
  }
  func.func @transform_2(%arg0: i32) -> (i32, i32) {
    %c0_i32 = arith.constant 0 : i32
    %c0_i32_0 = arith.constant 0 : i32
    return %arg0, %c0_i32 : i32, i32
  }
}

</mosaic_0001>

<bundles_post_ra>
// kernel: tpu_custom_call.1
= control target key start
LH: loop header
LB: loop body
LE: loop exit
PB: predicated region body
PF: predicated region fallthrough
CT: control target
= control target key end

     0   :  { %7 = vsyncpa [#allocation3], 0  ;;  %s1049_s0 = inlined_call_operand.hbm [shape: f32[128,128], index: 0, kind: input, shape index: {}]   ;;  %s1050_s1 = inlined_call_operand.hbm [shape: f32[128,128], index: 1, kind: input, shape index: {}]   ;;  %s1051_s2 = inlined_call_operand.hbm [shape: bf16[128,128], index: 2, kind: output, shape index: {}]  }
   0x1   :  { %9 = vsyncpa [#allocation3 + $0x1], 0 }
   0x2   :  { %10 = vsyncpa [#allocation6], 0 }
   0x3   :  { %11 = vsyncpa [#allocation4], 0 }
   0x4   :  { %13 = vsyncpa [#allocation4 + $0x1], 0  ;;  %s831_s9 = smov 0   ;;  %s833_s10 = smov 0  }
   0x5   :  { %s835_s11 = smov 0   ;;  %s837_s12 = smov 0  }
   0x6 LB: > { %s852_s13 = sadd.s32 4294967295, %s807_s12   ;;  %s445_s14 = sadd.s32 4294967294, %s807_s12   ;;  %s807_s12 = sphi %s837_s12, %s1071_s12   ;;  %s803_s11 = sphi %s835_s11, %s1070_s11   ;;  %s799_s10 = sphi %s833_s10, %s1069_s10   ;;  %s795_s9 = sphi %s831_s9, %s1068_s9  }
   0x7   : > { %p39_p0 = scmp.ne.s32.totalorder %s799_s10, %s795_s9  ;;  %p1052_p1 = scmp.eq.s32.totalorder %s852_s13, 0 }
   0x8   : > { %p90_p3 = scmp.eq.s32.totalorder %s445_s14, 1  ;;  %p446_p5 = scmp.ge.s32.totalorder %s807_s12, 1 }
   0x9   : > { %p861_p4 = por %p1052_p1, %p39_p0  ;;  %p97_p7 = scmp.lt.s32.totalorder %s807_s12, 3 }
   0xa   : > { %p866_p6 = por %p90_p3, %p39_p0  ;;  %s809_s18 = smov [#allocation5]  }
   0xb   : > { %s1055_s15 = scalar_select %p861_p4, 1, 0 }
   0xc   : > { %s1056_s16 = scalar_select %p866_p6, 1, 0 }
   0xd   : > { %p871_p8 = pnand %p446_p5, %p97_p7  ;;  %s109_s19 = sshll.u32 %s809_s18, 4  ;;  %s875_s19 = int_to_ptr.vmem [resolvable:$true] %s109_s19 }
   0xe   : > { %s887_s21 = sadd.s32 1, %s807_s12   ;;  %s26_s22 = sadd.s32 1, %s803_s11 }
   0xf   : > { %s1057_s17 = scalar_select %p871_p8, 1, 0 }
  0x10   : > { %p626_p9 = pneg %p871_p8  ;;  %s23_s23 = ssub.s32 %s807_s12, %s887_s21 }
  0x11   : > { %s679_s26 = scalar_lea.hbm %s1050_s1, 2048 }
  0x12   : > { %p882_p11 = pnand %p626_p9, %p1052_p1  ;;  %p680_p12 = scmp.ne.s32.totalorder %s1050_s1, %s679_s26 }
  0x13   : > { %p686_p5 = scmp.lt.u32.totalorder %s679_s26, %s1050_s1 }
  0x14   : > { %p681_p13 = pneg %p882_p11 }
  0x16   : > { %p682_p0 = pnand %p681_p13, %p680_p12 }
  0x18   : > { %p683_p3 = pneg %p682_p0 }
  0x1a   : > { %p688_p7 = pnand %p686_p5, %p683_p3 }
  0x1c   : > { %691 = shalt.err (!%p688_p7)
}
  0x1d   : > { %s692_s3 = scalar_lea.vmem %s875_s19, 2048  ;;  %p700_p2 = scmp.lt.s32.totalorder %s875_s19, %s875_s19 }
  0x1e   : > { %p693_p9 = scmp.ne.s32.totalorder %s875_s19, %s692_s3  ;;  %p701_p6 = scmp.lt.s32.totalorder %s692_s3, %s692_s3 }
  0x20   : > { %p695_p10 = pnand %p693_p9, %p681_p13  ;;  %p702_p4 = por %p701_p6, %p700_p2 }
  0x22   : > { %p696_p1 = pneg %p695_p10 }
  0x24   : > { %p703_p8 = pnand %p702_p4, %p696_p1 }
  0x26   : > { %706 = shalt.err (!%p703_p8)
}
  0x27   : > { %s810_s4 = smov 128   ;;  %s811_s5 = smov 8  }
  0x28   : > { %629 = dma.hbm_to_vmem [thread:$0]  (!%p882_p11), %s1050_s1, 2048, %s875_s19, [#allocation6], %s810_s4, %s810_s4, %s811_s5  }
  0x29   : > { %p24_p1 = scmp.eq.s32.totalorder %s23_s23, 0  ;;  %p33_p2 = scmp.ne.s32.totalorder %s803_s11, %s799_s10 }
  0x2a   : > { %p34_p4 = scmp.eq.s32.totalorder %s807_s12, 0  ;;  %p639_p6 = scmp.lt.s32.totalorder %s807_s12, 2 }
  0x2b   : > { %s921_s8 = scalar_select %p24_p1, %s803_s11, %s26_s22  }
  0x2c   : > { %p35_p8 = por %p34_p4, %p33_p2  ;;  %p1059_p10 = scmp.eq.s32.totalorder %s852_s13, 1 }
  0x2d   : > { %s123_s18 = sand.u32 1, %s803_s11   ;;  %s469_s20 = sshll.u32 %s807_s12, 10 }
  0x2e   : > { %p925_p12 = por %p1059_p10, %p33_p2  ;;  %s449_s24 = sshll.u32 %s123_s18, 6 }
  0x2f   : > { %s934_s27 = scalar_lea.hbm %s1049_s0, %s469_s20  ;;  %s127_s19 = scalar_lea.vmem [#allocation2], %s449_s24 }
  0x30   : > { %s134_s22 = sshll.u32 %s127_s19, 4  ;;  %p936_p11 = pnand %p639_p6, %p35_p8  ;;  %s940_s22 = int_to_ptr.vmem [resolvable:$true] %s134_s22 }
  0x31   : > { %s942_s28 = scalar_lea.sflag [#allocation3], %s123_s18  ;;  %s707_s29 = scalar_lea.hbm %s934_s27, 1024 }
  0x32   : > { %p708_p13 = scmp.ne.s32.totalorder %s934_s27, %s707_s29  ;;  %p709_p0 = pneg %p936_p11 }
  0x33   : > { %s712_s6 = scalar_lea.hbm %s1049_s0, 2048  ;;  %p713_p7 = scmp.lt.u32.totalorder %s934_s27, %s1049_s0 }
  0x34   : > { %p710_p3 = pnand %p709_p0, %p708_p13  ;;  %p714_p9 = scmp.lt.u32.totalorder %s712_s6, %s707_s29 }
  0x35   : > { %p716_p2 = scmp.lt.u32.totalorder %s707_s29, %s934_s27 }
  0x36   : > { %p711_p5 = pneg %p710_p3  ;;  %p715_p1 = por %p714_p9, %p713_p7 }
  0x38   : > { %p717_p4 = por %p716_p2, %p715_p1 }
  0x3a   : > { %p718_p6 = pnand %p717_p4, %p711_p5 }
  0x3c   : > { %721 = shalt.err (!%p718_p6)
}
  0x3d   : > { %s722_s18 = scalar_lea.vmem %s940_s22, 1024  ;;  %s812_s24 = smov [#allocation2]  }
  0x3e   : > { %p723_p8 = scmp.ne.s32.totalorder %s940_s22, %s722_s18  ;;  %s727_s25 = sshll.u32 %s812_s24, 4  ;;  %s728_s25 = int_to_ptr.vmem [resolvable:$false] %s727_s25 }
  0x3f   : > { %s729_s26 = scalar_lea.vmem %s728_s25, 2048  ;;  %p730_p3 = scmp.lt.s32.totalorder %s940_s22, %s728_s25 }
  0x40   : > { %p725_p10 = pnand %p723_p8, %p709_p0  ;;  %p731_p7 = scmp.lt.s32.totalorder %s729_s26, %s722_s18 }
  0x42   : > { %p726_p13 = pneg %p725_p10  ;;  %p732_p9 = por %p731_p7, %p730_p3 }
  0x44   : > { %p733_p1 = pnand %p732_p9, %p726_p13 }
  0x46   : > { %736 = shalt.err (!%p733_p1)
}
  0x47   : > { %633 = dma.hbm_to_vmem [thread:$0]  (!%p936_p11), %s934_s27, 1024, %s940_s22, %s942_s28, %s810_s4, %s810_s4, %s811_s5  }
  0x48   : > { %p1062_p0 = scmp.ne.s32.totalorder %s1057_s17, 0 }
  0x49   : > { %s976_s19 = sand.u32 (!%p1062_p0), 1, %s799_s10   ;;  %p1063_p5 = scmp.ne.s32.totalorder (!%p1062_p0), %s1055_s15, 0 }
  0x4a   : > { %146 = sbr.rel (%p1062_p0) target bundleno = 354 (0x162), region = 28  ;;  %s453_s29 = sshll.u32 (!%p1062_p0), %s976_s19, 6 }
  0x4b   : > { %s149_s30 = scalar_lea.sflag (!%p1062_p0), [#allocation3], %s976_s19  ;;  %s980_s3 = scalar_lea.vmem (!%p1062_p0), [#allocation2], %s453_s29 }
  0x51   : > { %782 = dma.done.wait (%p1063_p5), %s149_s30, 1024  }
  0x52   : > { %784 = vsyncadd (%p1063_p5), %s149_s30, 4294966272  ;;  %p1064_p11 = scmp.eq.s32.totalorder %s852_s13, 0 }
  0x54   : > { %786 = dma.done.wait (%p1064_p11), [#allocation6], 2048   ;;  %p1065_p2 = pmov %p1064_p11 }
  0x55   : > { %v187_v0 = vld [vmem:[#allocation5] sm:$0xff]  ;;  %v188_v1 = vld [vmem:[#allocation5 + $0x8] sm:$0xff]  ;;  %v189_v2 = vld [vmem:[#allocation5 + $0x10] sm:$0xff]  ;;  %s455_s15 = sshll.u32 %s976_s19, 5  ;;  %s478_s5 = sshll.u32 %s852_s13, 9 }
  0x56   : > { %788 = vsyncadd (%p1065_p2), [#allocation6], 4294965248  ;;  %v570_v3 = vpack.c.bf16 %v188_v1, %v187_v0  ;;  %v190_v4 = vld [vmem:[#allocation5 + $0x18] sm:$0xff]  ;;  %v191_v6 = vld [vmem:[#allocation5 + $0x20] sm:$0xff]  ;;  %s176_s17 = scalar_lea.vmem [#allocation7], %s455_s15  ;;  %s1005_s23 = scalar_lea.hbm %s1051_s2, %s478_s5 }
  0x57   : > { %v574_v5 = vpack.c.bf16 %v190_v4, %v189_v2  ;;  %v192_v7 = vld [vmem:[#allocation5 + $0x28] sm:$0xff]  ;;  %v179_v9 = vld [vmem:[%s980_s3] sm:$0xff]  ;;  %v193_v11 = vld [vmem:[#allocation5 + $0x30] sm:$0xff]  ;;  %s362_s4 = sshll.u32 %s176_s17, 4  ;;  %s349_s13 = scalar_lea.sflag [#allocation4], %s976_s19  ;;  %s1000_s4 = int_to_ptr.vmem [resolvable:$true] %s362_s4 }
  0x58   : > { %571 = vmatprep.subr.bf16.mxu0 %v570_v3  ;;  %602 = vmatprep.subr.bf16.mxu1 %v570_v3  ;;  %v578_v8 = vpack.c.bf16 %v192_v7, %v191_v6  ;;  %v183_v10 = vld [vmem:[%s980_s3 + $0x20] sm:$0xff]  ;;  %v194_v12 = vld [vmem:[#allocation5 + $0x38] sm:$0xff]  ;;  %v196_v15 = vld [vmem:[#allocation5 + $0x48] sm:$0xff]  ;;  %s737_s28 = scalar_lea.vmem %s1000_s4, 512  ;;  %s813_s6 = smov [#allocation7]  }
  0x59   : > { %573 = vmatpush3.bf16.msra.mxu0 %v570_v3  ;;  %610 = vmatpush3.bf16.msra.mxu1 %v570_v3  ;;  %v582_v13 = vpack.c.bf16 %v194_v12, %v193_v11  ;;  %v195_v14 = vld [vmem:[#allocation5 + $0x40] sm:$0xff]  ;;  %v197_v17 = vld [vmem:[#allocation5 + $0x50] sm:$0xff]  ;;  %v198_v18 = vld [vmem:[#allocation5 + $0x58] sm:$0xff]  ;;  %p738_p4 = scmp.ne.s32.totalorder %s1000_s4, %s737_s28  ;;  %s741_s7 = sshll.u32 %s813_s6, 4  ;;  %s742_s7 = int_to_ptr.vmem [resolvable:$false] %s741_s7 }
  0x5a   : > { %575 = vmatprep.subr.bf16.mxu0 %v574_v5  ;;  %603 = vmatprep.subr.bf16.mxu1 %v574_v5  ;;  %v586_v16 = vpack.c.bf16 %v196_v15, %v195_v14  ;;  %v590_v19 = vpack.c.bf16 %v198_v18, %v197_v17  ;;  %v199_v20 = vld [vmem:[#allocation5 + $0x60] sm:$0xff]  ;;  %v200_v21 = vld [vmem:[#allocation5 + $0x68] sm:$0xff]  ;;  %v201_v23 = vld [vmem:[#allocation5 + $0x70] sm:$0xff]  ;;  %s743_s20 = scalar_lea.vmem %s742_s7, 1024  ;;  %p744_p10 = scmp.lt.s32.totalorder %s1000_s4, %s742_s7 }
  0x5b   : > { %558 = vmatprep.mubr.f32.mxu0 %v179_v9  ;;  %564 = vmatprep.mubr.f32.mxu1 %v183_v10  ;;  %v594_v22 = vpack.c.bf16 %v200_v21, %v199_v20  ;;  %v202_v24 = vld [vmem:[#allocation5 + $0x78] sm:$0xff]  ;;  %v180_v26 = vld [vmem:[%s980_s3 + $0x8] sm:$0xff]  ;;  %v181_v28 = vld [vmem:[%s980_s3 + $0x10] sm:$0xff]  ;;  %p739_p6 = pnand %p738_p4, %p925_p12  ;;  %p745_p13 = scmp.lt.s32.totalorder %s743_s20, %s737_s28 }
  0x5c   : > { %v598_v25 = vpack.c.bf16 %v202_v24, %v201_v23  ;;  %v184_v27 = vld [vmem:[%s980_s3 + $0x28] sm:$0xff]  ;;  %v185_v29 = vld [vmem:[%s980_s3 + $0x30] sm:$0xff]  ;;  %v182_v30 = vld [vmem:[%s980_s3 + $0x18] sm:$0xff] }
  0x5d   : > { %577 = vmatpush3.bf16.msra.mxu0 %v574_v5  ;;  %611 = vmatpush3.bf16.msra.mxu1 %v574_v5  ;;  %v186_v31 = vld [vmem:[%s980_s3 + $0x38] sm:$0xff]  ;;  %p740_p8 = pneg %p739_p6  ;;  %p746_p3 = por %p745_p13, %p744_p10 }
  0x5e   : > { %579 = vmatprep.subr.bf16.mxu0 %v578_v8  ;;  %604 = vmatprep.subr.bf16.mxu1 %v578_v8 }
  0x5f   : > { %p747_p7 = pnand %p746_p3, %p740_p8 }
  0x61   : > { %581 = vmatpush3.bf16.msra.mxu0 %v578_v8  ;;  %612 = vmatpush3.bf16.msra.mxu1 %v578_v8 }
  0x62   : > { %583 = vmatprep.subr.bf16.mxu0 %v582_v13  ;;  %605 = vmatprep.subr.bf16.mxu1 %v582_v13 }
  0x65   : > { %585 = vmatpush3.bf16.msra.mxu0 %v582_v13  ;;  %613 = vmatpush3.bf16.msra.mxu1 %v582_v13 }
  0x66   : > { %587 = vmatprep.subr.bf16.mxu0 %v586_v16  ;;  %606 = vmatprep.subr.bf16.mxu1 %v586_v16 }
  0x69   : > { %589 = vmatpush3.bf16.msra.mxu0 %v586_v16  ;;  %614 = vmatpush3.bf16.msra.mxu1 %v586_v16 }
  0x6a   : > { %591 = vmatprep.subr.bf16.mxu0 %v590_v19  ;;  %607 = vmatprep.subr.bf16.mxu1 %v590_v19 }
  0x6d   : > { %593 = vmatpush3.bf16.msra.mxu0 %v590_v19  ;;  %615 = vmatpush3.bf16.msra.mxu1 %v590_v19 }
  0x6e   : > { %595 = vmatprep.subr.bf16.mxu0 %v594_v22  ;;  %608 = vmatprep.subr.bf16.mxu1 %v594_v22 }
  0x71   : > { %597 = vmatpush3.bf16.msra.mxu0 %v594_v22  ;;  %616 = vmatpush3.bf16.msra.mxu1 %v594_v22 }
  0x72   : > { %599 = vmatprep.subr.bf16.mxu0 %v598_v25  ;;  %609 = vmatprep.subr.bf16.mxu1 %v598_v25 }
  0x75   : > { %601 = vmatpush3.bf16.msra.mxu0 %v598_v25  ;;  %617 = vmatpush3.bf16.msra.mxu1 %v598_v25 }
  0x78   : > { %559 = vmatmul.mubr.f32.vlgmr.msra.gmra.mrb[0].mxu0 %v180_v26  ;;  %565 = vmatmul.mubr.f32.vlgmr.msra.gmra.mrb[0].mxu1 %v184_v27 }
  0x79   : > { %561 = vmatprep.mubr.f32.mxu0 %v181_v28  ;;  %567 = vmatprep.mubr.f32.mxu1 %v185_v29 }
  0x7c   : > { %562 = vmatmul.mubr.f32.gmra.mrb[2].mxu0 %v182_v30  ;;  %568 = vmatmul.mubr.f32.gmra.mrb[2].mxu1 %v186_v31 }
 0x14b   : > { %v560_v32 = vpop.f32.mrb[0].mxu0  ;;  %v566_v33 = vpop.f32.mrb[0].mxu1 }
 0x14c   : > { %v269_v34 = vpop.f32.mrb[1].mxu0  ;;  %v289_v35 = vpop.f32.mrb[1].mxu1 }
 0x14d   : > { %v482_v36 = vpack.c.bf16 %v560_v32, %v269_v34  ;;  %v492_v37 = vpack.c.bf16 %v566_v33, %v289_v35 }
 0x14f   : > { %483 = vst [vmem:[%s176_s17] sm:$0xff] %v482_v36   ;;  %500 = vst [vmem:[%s176_s17 + $0x10] sm:$0xff] %v492_v37   ;;  %v563_v38 = vpop.f32.mrb[2].mxu0  ;;  %v569_v39 = vpop.f32.mrb[2].mxu1 }
 0x150   : > { %v279_v40 = vpop.f32.mrb[3].mxu0  ;;  %v299_v41 = vpop.f32.mrb[3].mxu1 }
 0x151   : > { %v487_v42 = vpack.c.bf16 %v563_v38, %v279_v40  ;;  %v497_v43 = vpack.c.bf16 %v569_v39, %v299_v41 }
 0x153   : > { %499 = vst [vmem:[%s176_s17 + $0x8] sm:$0xff] %v487_v42   ;;  %501 = vst [vmem:[%s176_s17 + $0x18] sm:$0xff] %v497_v43  }
 0x154   : > { %750 = shalt.err (!%p747_p7)
}
 0x155   : > { %s751_s18 = scalar_lea.hbm %s1005_s23, 512  ;;  %s755_s26 = scalar_lea.hbm %s1051_s2, 1024 }
 0x156   : > { %p752_p9 = scmp.ne.s32.totalorder %s1005_s23, %s751_s18  ;;  %p756_p5 = scmp.lt.u32.totalorder %s1005_s23, %s1051_s2 }
 0x157   : > { %p757_p11 = scmp.lt.u32.totalorder %s755_s26, %s751_s18  ;;  %p759_p4 = scmp.lt.u32.totalorder %s751_s18, %s1005_s23 }
 0x158   : > { %p753_p1 = pnand %p752_p9, %p925_p12 }
 0x159   : > { %p758_p2 = por %p757_p11, %p756_p5 }
 0x15a   : > { %p754_p0 = pneg %p753_p1 }
 0x15b   : > { %p760_p6 = por %p759_p4, %p758_p2 }
 0x15d   : > { %p761_p8 = pnand %p760_p6, %p754_p0 }
 0x15f   : > { %764 = shalt.err (!%p761_p8)
}
 0x160   : > { %s814_s3 = smov 64   ;;  %s815_s15 = smov 4  }
 0x161   : > { %624 = dma.vmem_to_hbm [thread:$0]  (%p925_p12), %s1000_s4, 512, %s1005_s23, %s349_s13, %s814_s3, %s814_s3, %s815_s15  }
 0x162 PF: > { %s377_s17 = sand.u32 1, %s795_s9   ;;  %p1066_p10 = scmp.ne.s32.totalorder %s1056_s16, 0 }
 0x163   : > { %p1067_p13 = scmp.ge.s32.totalorder %s807_s12, 2  ;;  %s378_s5 = scalar_lea.sflag [#allocation4], %s377_s17 }
 0x165   : > { %p635_p3 = pnand %p1067_p13, %p1066_p10 }
 0x167   : > { %790 = dma.done.wait (!%p635_p3), %s378_s5, 512  }
 0x168   : > { %792 = vsyncadd (!%p635_p3), %s378_s5, 4294966784  ;;  %p16_p7 = scmp.ge.s32.totalorder %s887_s21, 4   ;;  %s1068_s9 = smov %s799_s10 }
 0x169   : > { %s1069_s10 = smov %s803_s11  ;;  %s1070_s11 = smov %s921_s8 }
 0x16a   : > { %s1071_s12 = smov %s887_s21  ;;  %18 = sbr.rel (!%p16_p7) target bundleno = 6 (0x6), region = 77 }
 0x171   :  { %383 = vsyncpa [#allocation3], 1 }
 0x172   :  { %385 = vsyncpa [#allocation3 + $0x1], 1 }
 0x173   :  { %386 = vsyncpa [#allocation6], 1 }
 0x174   :  { %387 = vsyncpa [#allocation4], 1 }
 0x175   :  { %389 = vsyncpa [#allocation4 + $0x1], 1 }

</bundles_post_ra>
